<compile_context>
chip_gen: v7x
topology: tpu7x:2x2x1
jax: 0.10.0
libtpu: 0.0.40
codegen_flags: <defaults>
</compile_context>

<pallas_src>
import jax
import jax.numpy as jnp
from jax.experimental import pallas as pl
from jax.experimental.pallas import tpu as pltpu

_LANES = 128


def _round_up(x, m):
    return ((x + m - 1) // m) * m


def _cdiv(a, b):
    return (a + b - 1) // b


def _sublane_mult(dtype):
    # f32 -> 8 rows per vreg, bf16 -> 16, int8/fp8 -> 32.
    return max(8, 32 // jnp.dtype(dtype).itemsize)


def _make_fused_kernel(groups, inv_numels, inv_batch):
    """groups: 4 tuples of (start_tile, n_tiles, tile_rows)."""

    def kernel(sig_ref, logits_ref, tgt_ref,
               a0, b0, a1, b1, a2, b2, a3, b3,
               out_ref, acc0, acc1, acc2, acc3):
        i = pl.program_id(0)
        accs = (acc0, acc1, acc2, acc3)

        @pl.when(i == 0)
        def _init():
            for acc in accs:
                acc[...] = jnp.zeros_like(acc)

        pairs = ((a0, b0), (a1, b1), (a2, b2), (a3, b3))
        for (a_ref, b_ref), acc_ref, (start, n_tiles, tr) in zip(pairs, accs, groups):

            @pl.when(jnp.logical_and(i >= start, i < start + n_tiles))
            def _accumulate(a_ref=a_ref, b_ref=b_ref, acc_ref=acc_ref, tr=tr):
                d = a_ref[...].astype(jnp.float32) - b_ref[...].astype(jnp.float32)
                sq = d * d
                # Layout-preserving reshape: sums whole vregs together (VALU only,
                # no XLU cross-sublane work in the steady state).  Raw SSE, no
                # per-step scaling -> scaled once in finalize.
                acc_ref[...] += sq.reshape(tr // 8, 8, _LANES).sum(axis=0)

        @pl.when(i == pl.num_programs(0) - 1)
        def _finalize():
            # ---- cross entropy over the stacked [4B, C] logits (mean reduction
            #      per head; sum of the 4 means == sum over 4B rows / B) ----
            logits = logits_ref[...].astype(jnp.float32)
            m = jnp.max(logits, axis=-1, keepdims=True)
            lse = jnp.log(jnp.sum(jnp.exp(logits - m), axis=-1, keepdims=True)) + m
            col = jax.lax.broadcasted_iota(jnp.int32, logits.shape, 1)
            picked = jnp.sum(jnp.where(col == tgt_ref[...], logits, 0.0),
                             axis=-1, keepdims=True)
            L1 = jnp.sum(lse - picked) * inv_batch

            # one-time cross-sublane/lane reduction of the (8,128) accumulators
            L2 = (jnp.sum(acc0[...]) * inv_numels[0]
                  + jnp.sum(acc1[...]) * inv_numels[1]
                  + jnp.sum(acc2[...]) * inv_numels[2])
            L3 = jnp.sum(acc3[...]) * inv_numels[3]

            # ---- uncertainty-weighted combination, fully in-kernel ----
            ls = sig_ref[...].astype(jnp.float32)          # (1,3) log sigmas
            w = jnp.exp(-2.0 * ls)                         # 1/sigma_i^2  (EUP)
            lane = jax.lax.broadcasted_iota(jnp.int32, ls.shape, 1)
            l_vec = jnp.where(lane == 0, L1, jnp.where(lane == 1, L2, L3))
            loss = jnp.sum(w * l_vec) + 2.0 * jnp.sum(ls)
            out_ref[...] = loss.reshape(1, 1)

    return kernel


def multi_uncertainty_weighted_loss(
    log_sigma1, log_sigma2, log_sigma3,
    output_1_g, output_2_g, output_3_g, output_concat_g, targets,
    map1_g, map1_ori, map2_g, map2_ori, map3_g, map3_ori,
    inputs_g, inputs_normal,
    *, max_tile_rows=1024,   # ~512 KiB/block f32; use 2048 on v7x for big maps
):
    B = output_1_g.shape[0]

    # ---- CE side: stack the 4 heads so CE runs once (tiny copies) ----
    logits = jnp.concatenate(
        [output_1_g, output_2_g, output_3_g, output_concat_g], axis=0)   # [4B, C]
    tgt = jnp.tile(targets.astype(jnp.int32), 4).reshape(4 * B, 1)       # [4B, 1]

    # ---- MSE side: lane-dense (rows, 128) slabs in ORIGINAL dtype,
    #      zero-padded to a whole number of per-pair tiles (no in-kernel mask,
    #      no OOB edge-block reads; zeros contribute 0 to the SSE while the
    #      divisor stays the TRUE element count). ----
    pairs = [(map1_g, map1_ori), (map2_g, map2_ori), (map3_g, map3_ori),
             (inputs_g, inputs_normal)]

    slabs, group_meta, inv_numels = [], [], []
    start = 0
    for a, b in pairs:
        numel = a.size
        rows = _cdiv(numel, _LANES)
        mult = max(_sublane_mult(a.dtype), _sublane_mult(b.dtype))
        tr = min(_round_up(max_tile_rows, mult), _round_up(rows, mult))
        n_tiles = _cdiv(rows, tr)
        padded_rows = n_tiles * tr

        def to_slab(x, padded_rows=padded_rows):
            flat = x.reshape(-1)
            pad = padded_rows * _LANES - flat.shape[0]
            if pad:
                flat = jnp.pad(flat, (0, pad))
            return flat.reshape(padded_rows, _LANES)

        slabs.append((to_slab(a), to_slab(b)))
        group_meta.append((start, n_tiles, tr))
        inv_numels.append(1.0 / numel)
        start += n_tiles
    total_tiles = start

    sig = jnp.stack([jnp.asarray(log_sigma1, jnp.float32),
                     jnp.asarray(log_sigma2, jnp.float32),
                     jnp.asarray(log_sigma3, jnp.float32)]).reshape(1, 3)

    kernel = _make_fused_kernel(tuple(group_meta), tuple(inv_numels), 1.0 / B)

    const2d = lambda i: (0, 0)   # resident small operands / output
    mse_specs, mse_args = [], []
    for k, (sa, sb) in enumerate(slabs):
        start_k, nt_k, tr_k = group_meta[k]
        # Clamped index_map: the block index only changes while this group is
        # active, so each byte is DMA'd exactly once and pipelining overlaps
        # DMA with the active group's compute.
        spec = pl.BlockSpec(
            (tr_k, _LANES),
            lambda i, start=start_k, nt=nt_k: (jnp.clip(i - start, 0, nt - 1), 0))
        mse_specs += [spec, spec]
        mse_args += [sa, sb]

    # ---- advisory cost estimate: HBM-bound streaming reduction ----
    slab_bytes = sum(int(s.size) * s.dtype.itemsize for p in slabs for s in p)
    total_mse_elems = sum(int(a.size) for a, _ in pairs)
    bytes_accessed = int(slab_bytes + logits.size * logits.dtype.itemsize
                         + tgt.size * 4 + sig.size * 4 + 4)
    cost = pl.CostEstimate(
        flops=int(3 * total_mse_elems + 8 * logits.size),
        transcendentals=int(logits.size + 3),
        bytes_accessed=bytes_accessed)

    out = pl.pallas_call(
        kernel,
        out_shape=jax.ShapeDtypeStruct((1, 1), jnp.float32),
        grid_spec=pltpu.PrefetchScalarGridSpec(
            num_scalar_prefetch=0,
            grid=(total_tiles,),
            in_specs=[pl.BlockSpec(sig.shape, const2d),
                      pl.BlockSpec(logits.shape, const2d),
                      pl.BlockSpec(tgt.shape, const2d)] + mse_specs,
            out_specs=pl.BlockSpec((1, 1), const2d),
            scratch_shapes=[pltpu.VMEM((8, _LANES), jnp.float32)] * 4),
        compiler_params=pltpu.CompilerParams(
            dimension_semantics=("arbitrary",),          # accumulators carried
            vmem_limit_bytes=32 * 1024 * 1024),
        cost_estimate=cost,
    )(sig, logits, tgt, *mse_args)
    return out[0, 0]


def _reference(ls1, ls2, ls3, o1, o2, o3, oc, t,
               m1g, m1o, m2g, m2o, m3g, m3o, ig, inorm):
    def ce(lo, tt):
        lo = lo.astype(jnp.float32)
        lse = jax.nn.logsumexp(lo, axis=-1)
        picked = jnp.take_along_axis(lo, tt[:, None], axis=-1)[:, 0]
        return jnp.mean(lse - picked)

    def mse(a, b):
        d = a.astype(jnp.float32) - b.astype(jnp.float32)
        return jnp.mean(d * d)

    L1 = ce(o1, t) + ce(o2, t) + ce(o3, t) + ce(oc, t)
    L2 = mse(m1g, m1o) + mse(m2g, m2o) + mse(m3g, m3o)
    L3 = mse(ig, inorm)
    return (jnp.exp(-2.0 * ls1) * L1 + jnp.exp(-2.0 * ls2) * L2
            + jnp.exp(-2.0 * ls3) * L3 + 2.0 * (ls1 + ls2 + ls3))


if __name__ == "__main__":
    key = jax.random.PRNGKey(0)
    ks = jax.random.split(key, 13)

    B, NUM_CLASSES = 2, 16
    MAP_SHAPE = (B, 4, 16, 16)   # NCHW
    IMG_SHAPE = (B, 3, 16, 16)   # NCHW

    # parameters: log_sigma_i = log(initial_sigma_i) = log(1.0) = 0.0
    log_sigma1 = jnp.float32(0.0)
    log_sigma2 = jnp.float32(0.0)
    log_sigma3 = jnp.float32(0.0)

    output_1_g = jax.random.normal(ks[0], (B, NUM_CLASSES), jnp.float32)
    output_2_g = jax.random.normal(ks[1], (B, NUM_CLASSES), jnp.float32)
    output_3_g = jax.random.normal(ks[2], (B, NUM_CLASSES), jnp.float32)
    output_concat_g = jax.random.normal(ks[3], (B, NUM_CLASSES), jnp.float32)
    targets = jax.random.randint(ks[4], (B,), 0, NUM_CLASSES, jnp.int32)

    map1_g = jax.random.normal(ks[5], MAP_SHAPE, jnp.float32)
    map1_ori = jax.random.normal(ks[6], MAP_SHAPE, jnp.float32)
    map2_g = jax.random.normal(ks[7], MAP_SHAPE, jnp.float32)
    map2_ori = jax.random.normal(ks[8], MAP_SHAPE, jnp.float32)
    map3_g = jax.random.normal(ks[9], MAP_SHAPE, jnp.float32)
    map3_ori = jax.random.normal(ks[10], MAP_SHAPE, jnp.float32)

    inputs_g = jax.random.normal(ks[11], IMG_SHAPE, jnp.float32)
    inputs_normal = jax.random.normal(ks[12], IMG_SHAPE, jnp.float32)

    args = (log_sigma1, log_sigma2, log_sigma3,
            output_1_g, output_2_g, output_3_g, output_concat_g, targets,
            map1_g, map1_ori, map2_g, map2_ori, map3_g, map3_ori,
            inputs_g, inputs_normal)

    loss = jax.jit(multi_uncertainty_weighted_loss)(*args)
    loss = jax.block_until_ready(loss)

    ref = jax.block_until_ready(_reference(*args))
    assert jnp.isfinite(loss), "loss is not finite"
    assert jnp.allclose(loss, ref, rtol=1e-3, atol=1e-3), (loss, ref)
    print("KERNEL_OK")
</pallas_src>

<mosaic_0001>
module attributes {stable_mosaic.version = 11 : i64} {
  func.func @kernel(%arg0: i32, %arg1: memref<1x3xf32, #tpu.memory_space<vmem>>, %arg2: memref<8x16xf32, #tpu.memory_space<vmem>>, %arg3: memref<8x1xi32, #tpu.memory_space<vmem>>, %arg4: memref<16x128xf32, #tpu.memory_space<vmem>>, %arg5: memref<16x128xf32, #tpu.memory_space<vmem>>, %arg6: memref<16x128xf32, #tpu.memory_space<vmem>>, %arg7: memref<16x128xf32, #tpu.memory_space<vmem>>, %arg8: memref<16x128xf32, #tpu.memory_space<vmem>>, %arg9: memref<16x128xf32, #tpu.memory_space<vmem>>, %arg10: memref<16x128xf32, #tpu.memory_space<vmem>>, %arg11: memref<16x128xf32, #tpu.memory_space<vmem>>, %arg12: memref<1x1xf32, #tpu.memory_space<vmem>>, %arg13: memref<8x128xf32, #tpu.memory_space<vmem>>, %arg14: memref<8x128xf32, #tpu.memory_space<vmem>>, %arg15: memref<8x128xf32, #tpu.memory_space<vmem>>, %arg16: memref<8x128xf32, #tpu.memory_space<vmem>>) attributes {dimension_semantics = [#tpu.dimension_semantics<arbitrary>], iteration_bounds = array<i64: 4>, scalar_prefetch = 0 : i64, scratch_operands = 4 : i64, tpu.core_type = #tpu.core_type<tc>, window_params = [{pipeline_mode = #tpu.pipeline_mode<synchronous>, transform_indices = @transform_0, window_bounds = array<i64: 1, 3>}, {pipeline_mode = #tpu.pipeline_mode<synchronous>, transform_indices = @transform_1, window_bounds = array<i64: 8, 16>}, {pipeline_mode = #tpu.pipeline_mode<synchronous>, transform_indices = @transform_2, window_bounds = array<i64: 8, 1>}, {transform_indices = @transform_3, window_bounds = array<i64: 16, 128>}, {transform_indices = @transform_4, window_bounds = array<i64: 16, 128>}, {transform_indices = @transform_5, window_bounds = array<i64: 16, 128>}, {transform_indices = @transform_6, window_bounds = array<i64: 16, 128>}, {transform_indices = @transform_7, window_bounds = array<i64: 16, 128>}, {transform_indices = @transform_8, window_bounds = array<i64: 16, 128>}, {transform_indices = @transform_9, window_bounds = array<i64: 16, 128>}, {transform_indices = @transform_10, window_bounds = array<i64: 16, 128>}, {pipeline_mode = #tpu.pipeline_mode<synchronous>, transform_indices = @transform_11, window_bounds = array<i64: 1, 1>}]} {
    %c0_i32 = arith.constant 0 : i32
    %0 = arith.cmpi eq, %arg0, %c0_i32 : i32
    %1 = arith.extui %0 : i1 to i32
    %c0_i32_0 = arith.constant 0 : i32
    %2 = arith.cmpi ne, %1, %c0_i32_0 : i32
    scf.if %2 {
      %cst = arith.constant 0.000000e+00 : f32
      %26 = vector.broadcast %cst : f32 to vector<8x128xf32>
      %c0 = arith.constant 0 : index
      %c0_11 = arith.constant 0 : index
      %27 = vector.load %arg13[%c0, %c0_11] : memref<8x128xf32, #tpu.memory_space<vmem>>, vector<8x128xf32>
      tpu.vector_store %arg13[%c0, %c0_11], %26 {strides = array<i32>} : memref<8x128xf32, #tpu.memory_space<vmem>>, vector<8x128xf32>,
      %cst_12 = arith.constant 0.000000e+00 : f32
      %28 = vector.broadcast %cst_12 : f32 to vector<8x128xf32>
      %c0_13 = arith.constant 0 : index
      %c0_14 = arith.constant 0 : index
      %29 = vector.load %arg14[%c0_13, %c0_14] : memref<8x128xf32, #tpu.memory_space<vmem>>, vector<8x128xf32>
      tpu.vector_store %arg14[%c0_13, %c0_14], %28 {strides = array<i32>} : memref<8x128xf32, #tpu.memory_space<vmem>>, vector<8x128xf32>,
      %cst_15 = arith.constant 0.000000e+00 : f32
      %30 = vector.broadcast %cst_15 : f32 to vector<8x128xf32>
      %c0_16 = arith.constant 0 : index
      %c0_17 = arith.constant 0 : index
      %31 = vector.load %arg15[%c0_16, %c0_17] : memref<8x128xf32, #tpu.memory_space<vmem>>, vector<8x128xf32>
      tpu.vector_store %arg15[%c0_16, %c0_17], %30 {strides = array<i32>} : memref<8x128xf32, #tpu.memory_space<vmem>>, vector<8x128xf32>,
      %cst_18 = arith.constant 0.000000e+00 : f32
      %32 = vector.broadcast %cst_18 : f32 to vector<8x128xf32>
      %c0_19 = arith.constant 0 : index
      %c0_20 = arith.constant 0 : index
      %33 = vector.load %arg16[%c0_19, %c0_20] : memref<8x128xf32, #tpu.memory_space<vmem>>, vector<8x128xf32>
      tpu.vector_store %arg16[%c0_19, %c0_20], %32 {strides = array<i32>} : memref<8x128xf32, #tpu.memory_space<vmem>>, vector<8x128xf32>,
    } else {
    }
    %c0_i32_1 = arith.constant 0 : i32
    %3 = arith.cmpi sge, %arg0, %c0_i32_1 : i32
    %c1_i32 = arith.constant 1 : i32
    %4 = arith.cmpi slt, %arg0, %c1_i32 : i32
    %5 = arith.andi %3, %4 : i1
    %6 = arith.extui %5 : i1 to i32
    %c0_i32_2 = arith.constant 0 : i32
    %7 = arith.cmpi ne, %6, %c0_i32_2 : i32
    scf.if %7 {
      %c0 = arith.constant 0 : index
      %c0_11 = arith.constant 0 : index
      %26 = vector.load %arg4[%c0, %c0_11] : memref<16x128xf32, #tpu.memory_space<vmem>>, vector<16x128xf32>
      %c0_12 = arith.constant 0 : index
      %c0_13 = arith.constant 0 : index
      %27 = vector.load %arg5[%c0_12, %c0_13] : memref<16x128xf32, #tpu.memory_space<vmem>>, vector<16x128xf32>
      %28 = arith.subf %26, %27 : vector<16x128xf32>
      %29 = arith.mulf %28, %28 : vector<16x128xf32>
      %c0_14 = arith.constant 0 : index
      %c0_15 = arith.constant 0 : index
      %30 = vector.load %arg13[%c0_14, %c0_15] : memref<8x128xf32, #tpu.memory_space<vmem>>, vector<8x128xf32>
      %31 = vector.shape_cast %29 : vector<16x128xf32> to vector<2x8x128xf32>
      %cst = arith.constant dense<0.000000e+00> : vector<8x128xf32>
      %32 = vector.multi_reduction <add>, %31, %cst [0] : vector<2x8x128xf32> to vector<8x128xf32>
      %33 = arith.addf %30, %32 : vector<8x128xf32>
      %c0_16 = arith.constant 0 : index
      %c0_17 = arith.constant 0 : index
      %34 = vector.load %arg13[%c0_16, %c0_17] : memref<8x128xf32, #tpu.memory_space<vmem>>, vector<8x128xf32>
      tpu.vector_store %arg13[%c0_16, %c0_17], %33 {strides = array<i32>} : memref<8x128xf32, #tpu.memory_space<vmem>>, vector<8x128xf32>,
    } else {
    }
    %c1_i32_3 = arith.constant 1 : i32
    %8 = arith.cmpi sge, %arg0, %c1_i32_3 : i32
    %c2_i32 = arith.constant 2 : i32
    %9 = arith.cmpi slt, %arg0, %c2_i32 : i32
    %10 = arith.andi %8, %9 : i1
    %11 = arith.extui %10 : i1 to i32
    %c0_i32_4 = arith.constant 0 : i32
    %12 = arith.cmpi ne, %11, %c0_i32_4 : i32
    scf.if %12 {
      %c0 = arith.constant 0 : index
      %c0_11 = arith.constant 0 : index
      %26 = vector.load %arg6[%c0, %c0_11] : memref<16x128xf32, #tpu.memory_space<vmem>>, vector<16x128xf32>
      %c0_12 = arith.constant 0 : index
      %c0_13 = arith.constant 0 : index
      %27 = vector.load %arg7[%c0_12, %c0_13] : memref<16x128xf32, #tpu.memory_space<vmem>>, vector<16x128xf32>
      %28 = arith.subf %26, %27 : vector<16x128xf32>
      %29 = arith.mulf %28, %28 : vector<16x128xf32>
      %c0_14 = arith.constant 0 : index
      %c0_15 = arith.constant 0 : index
      %30 = vector.load %arg14[%c0_14, %c0_15] : memref<8x128xf32, #tpu.memory_space<vmem>>, vector<8x128xf32>
      %31 = vector.shape_cast %29 : vector<16x128xf32> to vector<2x8x128xf32>
      %cst = arith.constant dense<0.000000e+00> : vector<8x128xf32>
      %32 = vector.multi_reduction <add>, %31, %cst [0] : vector<2x8x128xf32> to vector<8x128xf32>
      %33 = arith.addf %30, %32 : vector<8x128xf32>
      %c0_16 = arith.constant 0 : index
      %c0_17 = arith.constant 0 : index
      %34 = vector.load %arg14[%c0_16, %c0_17] : memref<8x128xf32, #tpu.memory_space<vmem>>, vector<8x128xf32>
      tpu.vector_store %arg14[%c0_16, %c0_17], %33 {strides = array<i32>} : memref<8x128xf32, #tpu.memory_space<vmem>>, vector<8x128xf32>,
    } else {
    }
    %c2_i32_5 = arith.constant 2 : i32
    %13 = arith.cmpi sge, %arg0, %c2_i32_5 : i32
    %c3_i32 = arith.constant 3 : i32
    %14 = arith.cmpi slt, %arg0, %c3_i32 : i32
    %15 = arith.andi %13, %14 : i1
    %16 = arith.extui %15 : i1 to i32
    %c0_i32_6 = arith.constant 0 : i32
    %17 = arith.cmpi ne, %16, %c0_i32_6 : i32
    scf.if %17 {
      %c0 = arith.constant 0 : index
      %c0_11 = arith.constant 0 : index
      %26 = vector.load %arg8[%c0, %c0_11] : memref<16x128xf32, #tpu.memory_space<vmem>>, vector<16x128xf32>
      %c0_12 = arith.constant 0 : index
      %c0_13 = arith.constant 0 : index
      %27 = vector.load %arg9[%c0_12, %c0_13] : memref<16x128xf32, #tpu.memory_space<vmem>>, vector<16x128xf32>
      %28 = arith.subf %26, %27 : vector<16x128xf32>
      %29 = arith.mulf %28, %28 : vector<16x128xf32>
      %c0_14 = arith.constant 0 : index
      %c0_15 = arith.constant 0 : index
      %30 = vector.load %arg15[%c0_14, %c0_15] : memref<8x128xf32, #tpu.memory_space<vmem>>, vector<8x128xf32>
      %31 = vector.shape_cast %29 : vector<16x128xf32> to vector<2x8x128xf32>
      %cst = arith.constant dense<0.000000e+00> : vector<8x128xf32>
      %32 = vector.multi_reduction <add>, %31, %cst [0] : vector<2x8x128xf32> to vector<8x128xf32>
      %33 = arith.addf %30, %32 : vector<8x128xf32>
      %c0_16 = arith.constant 0 : index
      %c0_17 = arith.constant 0 : index
      %34 = vector.load %arg15[%c0_16, %c0_17] : memref<8x128xf32, #tpu.memory_space<vmem>>, vector<8x128xf32>
      tpu.vector_store %arg15[%c0_16, %c0_17], %33 {strides = array<i32>} : memref<8x128xf32, #tpu.memory_space<vmem>>, vector<8x128xf32>,
    } else {
    }
    %c3_i32_7 = arith.constant 3 : i32
    %18 = arith.cmpi sge, %arg0, %c3_i32_7 : i32
    %c4_i32 = arith.constant 4 : i32
    %19 = arith.cmpi slt, %arg0, %c4_i32 : i32
    %20 = arith.andi %18, %19 : i1
    %21 = arith.extui %20 : i1 to i32
    %c0_i32_8 = arith.constant 0 : i32
    %22 = arith.cmpi ne, %21, %c0_i32_8 : i32
    scf.if %22 {
      %c0 = arith.constant 0 : index
      %c0_11 = arith.constant 0 : index
      %26 = vector.load %arg10[%c0, %c0_11] : memref<16x128xf32, #tpu.memory_space<vmem>>, vector<16x128xf32>
      %c0_12 = arith.constant 0 : index
      %c0_13 = arith.constant 0 : index
      %27 = vector.load %arg11[%c0_12, %c0_13] : memref<16x128xf32, #tpu.memory_space<vmem>>, vector<16x128xf32>
      %28 = arith.subf %26, %27 : vector<16x128xf32>
      %29 = arith.mulf %28, %28 : vector<16x128xf32>
      %c0_14 = arith.constant 0 : index
      %c0_15 = arith.constant 0 : index
      %30 = vector.load %arg16[%c0_14, %c0_15] : memref<8x128xf32, #tpu.memory_space<vmem>>, vector<8x128xf32>
      %31 = vector.shape_cast %29 : vector<16x128xf32> to vector<2x8x128xf32>
      %cst = arith.constant dense<0.000000e+00> : vector<8x128xf32>
      %32 = vector.multi_reduction <add>, %31, %cst [0] : vector<2x8x128xf32> to vector<8x128xf32>
      %33 = arith.addf %30, %32 : vector<8x128xf32>
      %c0_16 = arith.constant 0 : index
      %c0_17 = arith.constant 0 : index
      %34 = vector.load %arg16[%c0_16, %c0_17] : memref<8x128xf32, #tpu.memory_space<vmem>>, vector<8x128xf32>
      tpu.vector_store %arg16[%c0_16, %c0_17], %33 {strides = array<i32>} : memref<8x128xf32, #tpu.memory_space<vmem>>, vector<8x128xf32>,
    } else {
    }
    %c3_i32_9 = arith.constant 3 : i32
    %23 = arith.cmpi eq, %arg0, %c3_i32_9 : i32
    %24 = arith.extui %23 : i1 to i32
    %c0_i32_10 = arith.constant 0 : i32
    %25 = arith.cmpi ne, %24, %c0_i32_10 : i32
    scf.if %25 {
      %c0 = arith.constant 0 : index
      %c0_11 = arith.constant 0 : index
      %26 = vector.load %arg2[%c0, %c0_11] : memref<8x16xf32, #tpu.memory_space<vmem>>, vector<8x16xf32>
      %cst = arith.constant dense<0xFF800000> : vector<8xf32>
      %27 = vector.multi_reduction <maximumf>, %26, %cst [1] : vector<8x16xf32> to vector<8xf32>
      %28 = vector.shape_cast %27 : vector<8xf32> to vector<8x1xf32>
      %29 = vector.broadcast %28 : vector<8x1xf32> to vector<8x16xf32>
      %30 = arith.subf %26, %29 : vector<8x16xf32>
      %31 = math.exp %30 : vector<8x16xf32>
      %cst_12 = arith.constant dense<0.000000e+00> : vector<8xf32>
      %32 = vector.multi_reduction <add>, %31, %cst_12 [1] : vector<8x16xf32> to vector<8xf32>
      %33 = vector.shape_cast %32 : vector<8xf32> to vector<8x1xf32>
      %34 = math.log %33 : vector<8x1xf32>
      %35 = arith.addf %34, %28 : vector<8x1xf32>
      %36 = tpu.iota {dimensions = array<i32: 1>} : vector<8x16xi32>
      %c0_13 = arith.constant 0 : index
      %c0_14 = arith.constant 0 : index
      %37 = vector.load %arg3[%c0_13, %c0_14] : memref<8x1xi32, #tpu.memory_space<vmem>>, vector<8x1xi32>
      %38 = vector.broadcast %37 : vector<8x1xi32> to vector<8x16xi32>
      %39 = arith.cmpi eq, %36, %38 : vector<8x16xi32>
      %cst_15 = arith.constant 0.000000e+00 : f32
      %40 = vector.broadcast %cst_15 : f32 to vector<8x16xf32>
      %41 = arith.select %39, %26, %40 : vector<8x16xi1>, vector<8x16xf32>
      %cst_16 = arith.constant dense<0.000000e+00> : vector<8xf32>
      %42 = vector.multi_reduction <add>, %41, %cst_16 [1] : vector<8x16xf32> to vector<8xf32>
      %43 = vector.shape_cast %42 : vector<8xf32> to vector<8x1xf32>
      %44 = arith.subf %35, %43 : vector<8x1xf32>
      %45 = vector.shape_cast %44 : vector<8x1xf32> to vector<1x8x1xf32>
      %cst_17 = arith.constant dense<0.000000e+00> : vector<1xf32>
      %46 = vector.multi_reduction <add>, %45, %cst_17 [1, 2] : vector<1x8x1xf32> to vector<1xf32>
      %47 = vector.shape_cast %46 : vector<1xf32> to vector<1x1x1xf32>
      %48 = vector.extract %47[0, 0, 0] : f32 from vector<1x1x1xf32>
      %cst_18 = arith.constant 5.000000e-01 : f32
      %49 = arith.mulf %48, %cst_18 : f32
      %c0_19 = arith.constant 0 : index
      %c0_20 = arith.constant 0 : index
      %50 = vector.load %arg13[%c0_19, %c0_20] : memref<8x128xf32, #tpu.memory_space<vmem>>, vector<8x128xf32>
      %51 = vector.shape_cast %50 : vector<8x128xf32> to vector<1x8x128xf32>
      %cst_21 = arith.constant dense<0.000000e+00> : vector<1xf32>
      %52 = vector.multi_reduction <add>, %51, %cst_21 [1, 2] : vector<1x8x128xf32> to vector<1xf32>
      %53 = vector.shape_cast %52 : vector<1xf32> to vector<1x1x1xf32>
      %54 = vector.extract %53[0, 0, 0] : f32 from vector<1x1x1xf32>
      %cst_22 = arith.constant 4.8828125E-4 : f32
      %55 = arith.mulf %54, %cst_22 : f32
      %c0_23 = arith.constant 0 : index
      %c0_24 = arith.constant 0 : index
      %56 = vector.load %arg14[%c0_23, %c0_24] : memref<8x128xf32, #tpu.memory_space<vmem>>, vector<8x128xf32>
      %57 = vector.shape_cast %56 : vector<8x128xf32> to vector<1x8x128xf32>
      %cst_25 = arith.constant dense<0.000000e+00> : vector<1xf32>
      %58 = vector.multi_reduction <add>, %57, %cst_25 [1, 2] : vector<1x8x128xf32> to vector<1xf32>
      %59 = vector.shape_cast %58 : vector<1xf32> to vector<1x1x1xf32>
      %60 = vector.extract %59[0, 0, 0] : f32 from vector<1x1x1xf32>
      %cst_26 = arith.constant 4.8828125E-4 : f32
      %61 = arith.mulf %60, %cst_26 : f32
      %62 = arith.addf %55, %61 : f32
      %c0_27 = arith.constant 0 : index
      %c0_28 = arith.constant 0 : index
      %63 = vector.load %arg15[%c0_27, %c0_28] : memref<8x128xf32, #tpu.memory_space<vmem>>, vector<8x128xf32>
      %64 = vector.shape_cast %63 : vector<8x128xf32> to vector<1x8x128xf32>
      %cst_29 = arith.constant dense<0.000000e+00> : vector<1xf32>
      %65 = vector.multi_reduction <add>, %64, %cst_29 [1, 2] : vector<1x8x128xf32> to vector<1xf32>
      %66 = vector.shape_cast %65 : vector<1xf32> to vector<1x1x1xf32>
      %67 = vector.extract %66[0, 0, 0] : f32 from vector<1x1x1xf32>
      %cst_30 = arith.constant 4.8828125E-4 : f32
      %68 = arith.mulf %67, %cst_30 : f32
      %69 = arith.addf %62, %68 : f32
      %c0_31 = arith.constant 0 : index
      %c0_32 = arith.constant 0 : index
      %70 = vector.load %arg16[%c0_31, %c0_32] : memref<8x128xf32, #tpu.memory_space<vmem>>, vector<8x128xf32>
      %71 = vector.shape_cast %70 : vector<8x128xf32> to vector<1x8x128xf32>
      %cst_33 = arith.constant dense<0.000000e+00> : vector<1xf32>
      %72 = vector.multi_reduction <add>, %71, %cst_33 [1, 2] : vector<1x8x128xf32> to vector<1xf32>
      %73 = vector.shape_cast %72 : vector<1xf32> to vector<1x1x1xf32>
      %74 = vector.extract %73[0, 0, 0] : f32 from vector<1x1x1xf32>
      %cst_34 = arith.constant 6.51041686E-4 : f32
      %75 = arith.mulf %74, %cst_34 : f32
      %c0_35 = arith.constant 0 : index
      %c0_36 = arith.constant 0 : index
      %76 = vector.load %arg1[%c0_35, %c0_36] : memref<1x3xf32, #tpu.memory_space<vmem>>, vector<1x3xf32>
      %cst_37 = arith.constant -2.000000e+00 : f32
      %77 = vector.broadcast %cst_37 : f32 to vector<1x3xf32>
      %78 = arith.mulf %77, %76 : vector<1x3xf32>
      %79 = math.exp %78 : vector<1x3xf32>
      %80 = tpu.iota {dimensions = array<i32: 1>} : vector<1x3xi32>
      %c0_i32_38 = arith.constant 0 : i32
      %81 = vector.broadcast %c0_i32_38 : i32 to vector<1x3xi32>
      %82 = arith.cmpi eq, %80, %81 : vector<1x3xi32>
      %c1_i32_39 = arith.constant 1 : i32
      %83 = vector.broadcast %c1_i32_39 : i32 to vector<1x3xi32>
      %84 = arith.cmpi eq, %80, %83 : vector<1x3xi32>
      %85 = vector.broadcast %69 : f32 to vector<1x3xf32>
      %86 = vector.broadcast %75 : f32 to vector<1x3xf32>
      %87 = arith.select %84, %85, %86 : vector<1x3xi1>, vector<1x3xf32>
      %88 = vector.broadcast %49 : f32 to vector<1x3xf32>
      %89 = arith.select %82, %88, %87 : vector<1x3xi1>, vector<1x3xf32>
      %90 = arith.mulf %79, %89 : vector<1x3xf32>
      %91 = vector.shape_cast %90 : vector<1x3xf32> to vector<1x1x3xf32>
      %cst_40 = arith.constant dense<0.000000e+00> : vector<1xf32>
      %92 = vector.multi_reduction <add>, %91, %cst_40 [1, 2] : vector<1x1x3xf32> to vector<1xf32>
      %93 = vector.shape_cast %92 : vector<1xf32> to vector<1x1x1xf32>
      %94 = vector.extract %93[0, 0, 0] : f32 from vector<1x1x1xf32>
      %95 = vector.shape_cast %76 : vector<1x3xf32> to vector<1x1x3xf32>
      %cst_41 = arith.constant dense<0.000000e+00> : vector<1xf32>
      %96 = vector.multi_reduction <add>, %95, %cst_41 [1, 2] : vector<1x1x3xf32> to vector<1xf32>
      %97 = vector.shape_cast %96 : vector<1xf32> to vector<1x1x1xf32>
      %98 = vector.extract %97[0, 0, 0] : f32 from vector<1x1x1xf32>
      %cst_42 = arith.constant 2.000000e+00 : f32
      %99 = arith.mulf %cst_42, %98 : f32
      %100 = arith.addf %94, %99 : f32
      %101 = vector.broadcast %100 : f32 to vector<1x1xf32>
      %c0_43 = arith.constant 0 : index
      %c0_44 = arith.constant 0 : index
      %102 = vector.load %arg12[%c0_43, %c0_44] : memref<1x1xf32, #tpu.memory_space<vmem>>, vector<1x1xf32>
      tpu.vector_store %arg12[%c0_43, %c0_44], %101 {strides = array<i32>} : memref<1x1xf32, #tpu.memory_space<vmem>>, vector<1x1xf32>,
    } else {
    }
    return
  }
  func.func @transform_0(%arg0: i32) -> (i32, i32) {
    %c0_i32 = arith.constant 0 : i32
    %c0_i32_0 = arith.constant 0 : i32
    %c0_i32_1 = arith.constant 0 : i32
    return %c0_i32, %c0_i32_0 : i32, i32
  }
  func.func @transform_1(%arg0: i32) -> (i32, i32) {
    %c0_i32 = arith.constant 0 : i32
    %c0_i32_0 = arith.constant 0 : i32
    %c0_i32_1 = arith.constant 0 : i32
    return %c0_i32, %c0_i32_0 : i32, i32
  }
  func.func @transform_2(%arg0: i32) -> (i32, i32) {
    %c0_i32 = arith.constant 0 : i32
    %c0_i32_0 = arith.constant 0 : i32
    %c0_i32_1 = arith.constant 0 : i32
    return %c0_i32, %c0_i32_0 : i32, i32
  }
  func.func @transform_3(%arg0: i32) -> (i32, i32) {
    %c0_i32 = arith.constant 0 : i32
    %0 = arith.subi %arg0, %c0_i32 : i32
    %c0_i32_0 = arith.constant 0 : i32
    %c0_i32_1 = arith.constant 0 : i32
    %1 = arith.maxsi %c0_i32_0, %0 : i32
    %2 = arith.minsi %c0_i32_1, %1 : i32
    %c0_i32_2 = arith.constant 0 : i32
    %c0_i32_3 = arith.constant 0 : i32
    return %2, %c0_i32_2 : i32, i32
  }
  func.func @transform_4(%arg0: i32) -> (i32, i32) {
    %c0_i32 = arith.constant 0 : i32
    %0 = arith.subi %arg0, %c0_i32 : i32
    %c0_i32_0 = arith.constant 0 : i32
    %c0_i32_1 = arith.constant 0 : i32
    %1 = arith.maxsi %c0_i32_0, %0 : i32
    %2 = arith.minsi %c0_i32_1, %1 : i32
    %c0_i32_2 = arith.constant 0 : i32
    %c0_i32_3 = arith.constant 0 : i32
    return %2, %c0_i32_2 : i32, i32
  }
  func.func @transform_5(%arg0: i32) -> (i32, i32) {
    %c1_i32 = arith.constant 1 : i32
    %0 = arith.subi %arg0, %c1_i32 : i32
    %c0_i32 = arith.constant 0 : i32
    %c0_i32_0 = arith.constant 0 : i32
    %1 = arith.maxsi %c0_i32, %0 : i32
    %2 = arith.minsi %c0_i32_0, %1 : i32
    %c0_i32_1 = arith.constant 0 : i32
    %c0_i32_2 = arith.constant 0 : i32
    return %2, %c0_i32_1 : i32, i32
  }
  func.func @transform_6(%arg0: i32) -> (i32, i32) {
    %c1_i32 = arith.constant 1 : i32
    %0 = arith.subi %arg0, %c1_i32 : i32
    %c0_i32 = arith.constant 0 : i32
    %c0_i32_0 = arith.constant 0 : i32
    %1 = arith.maxsi %c0_i32, %0 : i32
    %2 = arith.minsi %c0_i32_0, %1 : i32
    %c0_i32_1 = arith.constant 0 : i32
    %c0_i32_2 = arith.constant 0 : i32
    return %2, %c0_i32_1 : i32, i32
  }
  func.func @transform_7(%arg0: i32) -> (i32, i32) {
    %c2_i32 = arith.constant 2 : i32
    %0 = arith.subi %arg0, %c2_i32 : i32
    %c0_i32 = arith.constant 0 : i32
    %c0_i32_0 = arith.constant 0 : i32
    %1 = arith.maxsi %c0_i32, %0 : i32
    %2 = arith.minsi %c0_i32_0, %1 : i32
    %c0_i32_1 = arith.constant 0 : i32
    %c0_i32_2 = arith.constant 0 : i32
    return %2, %c0_i32_1 : i32, i32
  }
  func.func @transform_8(%arg0: i32) -> (i32, i32) {
    %c2_i32 = arith.constant 2 : i32
    %0 = arith.subi %arg0, %c2_i32 : i32
    %c0_i32 = arith.constant 0 : i32
    %c0_i32_0 = arith.constant 0 : i32
    %1 = arith.maxsi %c0_i32, %0 : i32
    %2 = arith.minsi %c0_i32_0, %1 : i32
    %c0_i32_1 = arith.constant 0 : i32
    %c0_i32_2 = arith.constant 0 : i32
    return %2, %c0_i32_1 : i32, i32
  }
  func.func @transform_9(%arg0: i32) -> (i32, i32) {
    %c3_i32 = arith.constant 3 : i32
    %0 = arith.subi %arg0, %c3_i32 : i32
    %c0_i32 = arith.constant 0 : i32
    %c0_i32_0 = arith.constant 0 : i32
    %1 = arith.maxsi %c0_i32, %0 : i32
    %2 = arith.minsi %c0_i32_0, %1 : i32
    %c0_i32_1 = arith.constant 0 : i32
    %c0_i32_2 = arith.constant 0 : i32
    return %2, %c0_i32_1 : i32, i32
  }
  func.func @transform_10(%arg0: i32) -> (i32, i32) {
    %c3_i32 = arith.constant 3 : i32
    %0 = arith.subi %arg0, %c3_i32 : i32
    %c0_i32 = arith.constant 0 : i32
    %c0_i32_0 = arith.constant 0 : i32
    %1 = arith.maxsi %c0_i32, %0 : i32
    %2 = arith.minsi %c0_i32_0, %1 : i32
    %c0_i32_1 = arith.constant 0 : i32
    %c0_i32_2 = arith.constant 0 : i32
    return %2, %c0_i32_1 : i32, i32
  }
  func.func @transform_11(%arg0: i32) -> (i32, i32) {
    %c0_i32 = arith.constant 0 : i32
    %c0_i32_0 = arith.constant 0 : i32
    %c0_i32_1 = arith.constant 0 : i32
    return %c0_i32, %c0_i32_0 : i32, i32
  }
}

</mosaic_0001>

<bundles_post_ra>
// kernel: tile.0
= control target key start
LH: loop header
LB: loop body
LE: loop exit
PB: predicated region body
PF: predicated region fallthrough
CT: control target
= control target key end

     0   :  { %vm7_vm0 = vcmask 7168   ;;  %s37_s0 = inlined_call_operand.vmem [shape: s32[4,2], index: 0, kind: input, shape index: {}]   ;;  %s38_s1 = inlined_call_operand.vmem [shape: s32[8,1], index: 1, kind: output, shape index: {}]  }
   0x1   :  { %v4_v0 = vld [vmem:[%s37_s0] sm:$0xf]  ;;  %s17_s0 = smov 127  }
   0x2   :  { %5 = vst [vmem:[#allocation0] sm:$0xf] %v4_v0 }
   0x9   :  { %v9_v1 = vld [vmem:[#allocation0] sm:$0xf]  }
   0xa   :  { %v6_v2 = vld [vmem:[#allocation0] sm:$0xf]   ;;  %10 = vrot.lane.b32.xlu0 %v9_v1, %s17_s0 }
   0xb   :  { %8 = vst.msk [vmem:[%s38_s1] ss:$2 sm:$0xf] %vm7_vm0, %v6_v2  }
  0x7c   :  { %v11_v3 = vpop.permute.xlu0 %10  }
  0x7d   :  { %15 = vst.msk [vmem:[%s38_s1 + $0x1] ss:$2 sm:$0xf] %vm7_vm0, %v11_v3  }

// kernel: tile.8
= control target key start
LH: loop header
LB: loop body
LE: loop exit
PB: predicated region body
PF: predicated region fallthrough
CT: control target
= control target key end

     0   :  { %s22_s0 = inlined_call_operand.vmem [shape: s32[2], index: 0, kind: input, shape index: {}]   ;;  %s23_s1 = inlined_call_operand.vmem [shape: s32[4,2], index: 1, kind: output, shape index: {}]  }
   0x1   :  { %v4_v0 = vld [vmem:[%s22_s0] ss:$0 sm:$0xff] }
   0x2   :  { %5 = vst [vmem:[%s23_s1] sm:$0xf] %v4_v0 }

// kernel: multi_uncertainty_weighted_loss.1
= control target key start
LH: loop header
LB: loop body
LE: loop exit
PB: predicated region body
PF: predicated region fallthrough
CT: control target
= control target key end

     0   :  { %16 = vsyncpa [#allocation7], 0  ;;  %s1434_s17 = smov 0   ;;  %s1545_s0 = inlined_call_operand.vmem [shape: f32[1,3], index: 0, kind: input, shape index: {}]   ;;  %s1546_s1 = inlined_call_operand.vmem [shape: f32[8,16], index: 1, kind: input, shape index: {}]   ;;  %s1547_s2 = inlined_call_operand.vmem [shape: s32[8,1], index: 2, kind: input, shape index: {}]   ;;  %s1548_s3 = inlined_call_operand.vmem [shape: f32[16,128], index: 3, kind: input, shape index: {}]   ;;  %s1549_s4 = inlined_call_operand.vmem [shape: f32[16,128], index: 4, kind: input, shape index: {}]   ;;  %s1550_s5 = inlined_call_operand.vmem [shape: f32[16,128], index: 5, kind: input, shape index: {}]   ;;  %s1551_s6 = inlined_call_operand.vmem [shape: f32[16,128], index: 6, kind: input, shape index: {}]   ;;  %s1552_s7 = inlined_call_operand.vmem [shape: f32[16,128], index: 7, kind: input, shape index: {}]   ;;  %s1553_s8 = inlined_call_operand.vmem [shape: f32[16,128], index: 8, kind: input, shape index: {}]   ;;  %s1554_s9 = inlined_call_operand.vmem [shape: f32[16,128], index: 9, kind: input, shape index: {}]   ;;  %s1555_s10 = inlined_call_operand.vmem [shape: f32[16,128], index: 10, kind: input, shape index: {}]   ;;  %s1556_s11 = inlined_call_operand.hbm [shape: f32[1,1], index: 11, kind: output, shape index: {}]  }
   0x1 LB: > { %s1440_s18 = sadd.s32 4294967295, %s1369_s17   ;;  %p1226_p0 = scmp.ge.s32.totalorder %s1369_s17, 1  ;;  %s1369_s17 = sphi %s1434_s17, %s22_s17  }
   0x2   : > { %p563_p1 = scmp.lt.s32.totalorder %s1369_s17, 5 }
   0x4   : > { %p564_p2 = pnand %p1226_p0, %p563_p1 }
   0x5   : > { %p1289_p3 = scmp.ne.s32.totalorder (!%p564_p2), %s1440_s18, 0 }
   0x6   : > { %567 = sbr.rel (%p564_p2) target bundleno = 854 (0x356), region = 64 }
   0xd   : > { %798 = sbr.rel (%p1289_p3) target bundleno = 20 (0x14), region = 68  ;;  %v1371_v0 = vmov (!%p1289_p3), 0.0  }
   0xe   : > { %799 = vst [vmem:[#allocation2] sm:$0xff] (!%p1289_p3), %v1371_v0  ;;  %800 = vst [vmem:[#allocation3] sm:$0xff] (!%p1289_p3), %v1371_v0 }
   0xf   : > { %801 = vst [vmem:[#allocation4] sm:$0xff] (!%p1289_p3), %v1371_v0  ;;  %802 = vst [vmem:[#allocation5] sm:$0xff] (!%p1289_p3), %v1371_v0 }
  0x14 PF: > { %p803_p4 = scmp.ge.s32.totalorder %s1440_s18, 0  ;;  %p804_p5 = scmp.lt.s32.totalorder %s1440_s18, 1 }
  0x16   : > { %p805_p6 = pnand %p804_p5, %p803_p4 }
  0x17   : > { %v809_v1 = vld [vmem:[%s1548_s3] sm:$0xff] (!%p805_p6)  ;;  %v810_v2 = vld [vmem:[%s1548_s3 + $0x8] sm:$0xff] (!%p805_p6) }
  0x18   : > { %808 = sbr.rel (%p805_p6) target bundleno = 34 (0x22), region = 72  ;;  %v811_v3 = vld [vmem:[%s1549_s4] sm:$0xff] (!%p805_p6)  ;;  %v812_v4 = vld [vmem:[%s1549_s4 + $0x8] sm:$0xff] (!%p805_p6) }
  0x19   : > { %v813_v5 = vsub.f32 (!%p805_p6), %v809_v1, %v811_v3  ;;  %v814_v6 = vsub.f32 (!%p805_p6), %v810_v2, %v812_v4  ;;  %v817_v9 = vld [vmem:[#allocation2] sm:$0xff] (!%p805_p6) }
  0x1b   : > { %v815_v7 = vmul.f32 (!%p805_p6), %v813_v5, %v813_v5  ;;  %v816_v8 = vmul.f32 (!%p805_p6), %v814_v6, %v814_v6 }
  0x1d   : > { %v818_v10 = vadd.f32 (!%p805_p6), %v816_v8, %v815_v7 }
  0x1f   : > { %v819_v11 = vadd.f32 %v818_v10, %v817_v9 }
  0x21   : > { %820 = vst [vmem:[#allocation2] sm:$0xff] %v819_v11 }
  0x22 PF: > { %p821_p7 = scmp.ge.s32.totalorder %s1440_s18, 1  ;;  %p822_p8 = scmp.lt.s32.totalorder %s1440_s18, 2 }
  0x24   : > { %p823_p9 = pnand %p822_p8, %p821_p7 }
  0x25   : > { %v827_v12 = vld [vmem:[%s1550_s5] sm:$0xff] (!%p823_p9)  ;;  %v828_v13 = vld [vmem:[%s1550_s5 + $0x8] sm:$0xff] (!%p823_p9) }
  0x26   : > { %826 = sbr.rel (%p823_p9) target bundleno = 48 (0x30), region = 76  ;;  %v829_v14 = vld [vmem:[%s1551_s6] sm:$0xff] (!%p823_p9)  ;;  %v830_v15 = vld [vmem:[%s1551_s6 + $0x8] sm:$0xff] (!%p823_p9) }
  0x27   : > { %v831_v16 = vsub.f32 (!%p823_p9), %v827_v12, %v829_v14  ;;  %v832_v17 = vsub.f32 (!%p823_p9), %v828_v13, %v830_v15  ;;  %v835_v20 = vld [vmem:[#allocation3] sm:$0xff] (!%p823_p9) }
  0x29   : > { %v833_v18 = vmul.f32 (!%p823_p9), %v831_v16, %v831_v16  ;;  %v834_v19 = vmul.f32 (!%p823_p9), %v832_v17, %v832_v17 }
  0x2b   : > { %v836_v21 = vadd.f32 (!%p823_p9), %v834_v19, %v833_v18 }
  0x2d   : > { %v837_v22 = vadd.f32 %v836_v21, %v835_v20 }
  0x2f   : > { %838 = vst [vmem:[#allocation3] sm:$0xff] %v837_v22 }
  0x30 PF: > { %p839_p10 = scmp.ge.s32.totalorder %s1440_s18, 2  ;;  %p840_p11 = scmp.lt.s32.totalorder %s1440_s18, 3 }
  0x32   : > { %p841_p12 = pnand %p840_p11, %p839_p10 }
  0x33   : > { %v845_v23 = vld [vmem:[%s1552_s7] sm:$0xff] (!%p841_p12)  ;;  %v846_v24 = vld [vmem:[%s1552_s7 + $0x8] sm:$0xff] (!%p841_p12)  ;;  %v853_v31 = vld [vmem:[#allocation4] sm:$0xff] (!%p841_p12) }
  0x34   : > { %844 = sbr.rel (%p841_p12) target bundleno = 62 (0x3e), region = 80  ;;  %v847_v25 = vld [vmem:[%s1553_s8] sm:$0xff] (!%p841_p12)  ;;  %v848_v26 = vld [vmem:[%s1553_s8 + $0x8] sm:$0xff] (!%p841_p12) }
  0x35   : > { %v849_v27 = vsub.f32 (!%p841_p12), %v845_v23, %v847_v25  ;;  %v850_v28 = vsub.f32 (!%p841_p12), %v846_v24, %v848_v26 }
  0x37   : > { %v851_v29 = vmul.f32 (!%p841_p12), %v849_v27, %v849_v27  ;;  %v852_v30 = vmul.f32 (!%p841_p12), %v850_v28, %v850_v28 }
  0x39   : > { %v854_v32 = vadd.f32 (!%p841_p12), %v852_v30, %v851_v29 }
  0x3b   : > { %v855_v33 = vadd.f32 %v854_v32, %v853_v31 }
  0x3d   : > { %856 = vst [vmem:[#allocation4] sm:$0xff] %v855_v33 }
  0x3e PF: > { %p857_p13 = scmp.ge.s32.totalorder %s1440_s18, 3  ;;  %p858_p0 = scmp.lt.s32.totalorder %s1440_s18, 4 }
  0x40   : > { %p859_p1 = pnand %p858_p0, %p857_p13 }
  0x41   : > { %v863_v34 = vld [vmem:[%s1554_s9] sm:$0xff] (!%p859_p1)  ;;  %v864_v35 = vld [vmem:[%s1554_s9 + $0x8] sm:$0xff] (!%p859_p1)  ;;  %v871_v42 = vld [vmem:[#allocation5] sm:$0xff] (!%p859_p1) }
  0x42   : > { %862 = sbr.rel (%p859_p1) target bundleno = 76 (0x4c), region = 84  ;;  %v865_v36 = vld [vmem:[%s1555_s10] sm:$0xff] (!%p859_p1)  ;;  %v866_v37 = vld [vmem:[%s1555_s10 + $0x8] sm:$0xff] (!%p859_p1) }
  0x43   : > { %v867_v38 = vsub.f32 (!%p859_p1), %v863_v34, %v865_v36  ;;  %v868_v39 = vsub.f32 (!%p859_p1), %v864_v35, %v866_v37 }
  0x45   : > { %v869_v40 = vmul.f32 (!%p859_p1), %v867_v38, %v867_v38  ;;  %v870_v41 = vmul.f32 (!%p859_p1), %v868_v39, %v868_v39 }
  0x47   : > { %v872_v43 = vadd.f32 (!%p859_p1), %v870_v41, %v869_v40 }
  0x49   : > { %v873_v44 = vadd.f32 %v872_v43, %v871_v42 }
  0x4b   : > { %874 = vst [vmem:[#allocation5] sm:$0xff] %v873_v44 }
  0x4c PF: > { %p1290_p2 = scmp.ne.s32.totalorder %s1440_s18, 3 }
  0x4d   : > { %v879_v45 = vld [vmem:[%s1546_s1] sm:$0xff] (!%p1290_p2)  ;;  %vm880_vm0 = vcmask (!%p1290_p2), 130048   ;;  %v1372_v47 = vmov (!%p1290_p2), 0   ;;  %v893_v52 = vlaneseq (!%p1290_p2)  ;;  %v928_v60 = vld [vmem:[#allocation3] sm:$0xff] (!%p1290_p2)  ;;  %v940_v61 = vld [vmem:[#allocation4] sm:$0xff] (!%p1290_p2)  ;;  %vm905_vm2 = vcmask (!%p1290_p2), 7168  }
  0x4e   : > { %878 = sbr.rel (%p1290_p2) target bundleno = 829 (0x33d), region = 88  ;;  %v881_v46 = vsel (!%p1290_p2), %vm880_vm0, %v879_v45, -inf  ;;  %1326 = vset.pattern.permute.xlu0 (!%p1290_p2), %v1372_v47  ;;  %v895_v48 = vld [vmem:[%s1547_s2] sm:$0xff] (!%p1290_p2)  ;;  %vm975_vm5 = vcmask (!%p1290_p2), 16384   ;;  %vm999_vm6 = vcmask (!%p1290_p2), 0  }
  0x4f   : > { %882 = vmax.xlane.f32.xlu0 (!%p1290_p2), %v881_v46  ;;  %v1509_v53 = vand.u32 (!%p1290_p2), 127, %v893_v52  ;;  %v917_v59 = vld [vmem:[#allocation2] sm:$0xff] (!%p1290_p2) }
  0x50   : > { %v963_v41 = vld [vmem:[%s1545_s0] sm:$0x1] (!%p1290_p2) }
  0x51   : > { %v964_v42 = vmul.f32 (!%p1290_p2), -2.0, %v963_v41  ;;  %vm968_vm3 = vcmp.eq.s32.totalorder (!%p1290_p2), %v1509_v53, 1  ;;  %vm967_vm4 = vcmp.eq.s32.totalorder (!%p1290_p2), %v1509_v53, 0  ;;  %v986_v52 = vsel (!%p1290_p2), %vm975_vm5, %v963_v41, 0.0 }
  0x52   : > { %v952_v5 = vld [vmem:[#allocation5] sm:$0xff] (!%p1290_p2) }
  0x53   : > { %v965_v43 = vmul.f32 (!%p1290_p2), 1.442695, %v964_v42 }
  0x65   : > { %897 = vperm.xlu0 %1326, %v895_v48  }
  0xdc   : > { %v883_v49 = vpop.xlane.xlu0 %882 }
  0xdd   : > { %v884_v50 = vsub.f32 %v879_v45, %v883_v49 }
  0xdf   : > { %v885_v51 = vmul.f32 1.442695, %v884_v50 }
  0xe1   : > { %1327 = vpow2.f32 %v885_v51 }
  0xe4   : > { %v898_v54 = vpop.permute.xlu0 %897 }
  0xe5   : > { %vm899_vm1 = vcmp.eq.s32.totalorder %v1509_v53, %v898_v54 }
  0xe6   : > { %v900_v56 = vsel %vm899_vm1, %v879_v45, 0.0 }
  0xe7   : > { %v901_v58 = vsel %vm880_vm0, %v900_v56, 0.0 }
  0xeb   : > { %v1328_v55 = vpop.eup %1327 }
  0xec   : > { %v887_v57 = vsel %vm880_vm0, %v1328_v55, 0.0 }
  0xed   : > { %888 = vadd.xlane.f32.xlu1 %v887_v57 }
  0xf1   : > { %902 = vadd.xlane.f32.xlu1 %v901_v58 }
  0xf5   : > { %918 = vadd.xlane.f32.xlu1 %v917_v59 }
  0xf9   : > { %929 = vadd.xlane.f32.xlu1 %v928_v60 }
  0xfd   : > { %941 = vadd.xlane.f32.xlu1 %v940_v61 }
 0x17a   : > { %v889_v62 = vpop.xlane.xlu1 %888 }
 0x17b   : > { %1329 = vlog2.f32 %v889_v62 }
 0x17c   : > { %1331 = vpow2.f32 %v965_v43 }
 0x17e   : > { %v903_v1 = vpop.xlane.xlu1 %902 }
 0x182   : > { %v919_v6 = vpop.xlane.xlu1 %918 }
 0x183   : > { %v920_v9 = vrot.slane %v919_v6, 4 }
 0x185   : > { %v1330_v63 = vpop.eup %1329  ;;  %v921_v12 = vadd.f32 %v920_v9, %v919_v6 }
 0x186   : > { %v891_v0 = vmul.f32 0.6931472, %v1330_v63  ;;  %v930_v7 = vpop.xlane.xlu1 %929  ;;  %v1332_v45 = vpop.eup %1331 }
 0x187   : > { %v931_v10 = vrot.slane %v930_v7, 4  ;;  %v922_v15 = vrot.slane %v921_v12, 2 }
 0x188   : > { %v892_v2 = vadd.f32 %v891_v0, %v883_v49 }
 0x189   : > { %v932_v13 = vadd.f32 %v931_v10, %v930_v7  ;;  %v923_v22 = vadd.f32 %v922_v15, %v921_v12 }
 0x18a   : > { %v904_v3 = vsub.f32 %v892_v2, %v903_v1  ;;  %v942_v8 = vpop.xlane.xlu1 %941 }
 0x18b   : > { %v943_v11 = vrot.slane %v942_v8, 4  ;;  %v933_v17 = vrot.slane %v932_v13, 2  ;;  %v924_v29 = vrot.slane %v923_v22, 1 }
 0x18c   : > { %v906_v4 = vsel %vm905_vm2, %v904_v3, 0.0 }
 0x18d   : > { %907 = vadd.xlane.f32.xlu1 %v906_v4  ;;  %v944_v14 = vadd.f32 %v943_v11, %v942_v8  ;;  %v934_v25 = vadd.f32 %v933_v17, %v932_v13  ;;  %v925_v36 = vadd.f32 %v924_v29, %v923_v22 }
 0x18f   : > { %v945_v19 = vrot.slane %v944_v14, 2  ;;  %v935_v32 = vrot.slane %v934_v25, 1 }
 0x191   : > { %953 = vadd.xlane.f32.xlu1 %v952_v5  ;;  %v946_v26 = vadd.f32 %v945_v19, %v944_v14  ;;  %v936_v37 = vadd.f32 %v935_v32, %v934_v25 }
 0x193   : > { %v947_v33 = vrot.slane %v946_v26, 1 }
 0x195   : > { %v948_v39 = vadd.f32 %v947_v33, %v946_v26 }
 0x21a   : > { %v908_v16 = vpop.xlane.xlu1 %907 }
 0x21b   : > { %v909_v18 = vrot.slane %v908_v16, 4 }
 0x21d   : > { %v910_v20 = vadd.f32 %v909_v18, %v908_v16 }
 0x21e   : > { %v954_v21 = vpop.xlane.xlu1 %953 }
 0x21f   : > { %v911_v23 = vrot.slane %v910_v20, 2  ;;  %v955_v24 = vrot.slane %v954_v21, 4 }
 0x221   : > { %v956_v27 = vadd.f32 %v955_v24, %v954_v21  ;;  %v912_v28 = vadd.f32 %v911_v23, %v910_v20 }
 0x223   : > { %v957_v30 = vrot.slane %v956_v27, 2  ;;  %v913_v31 = vrot.slane %v912_v28, 1 }
 0x225   : > { %v914_v34 = vadd.f32 %v913_v31, %v912_v28  ;;  %v958_v35 = vadd.f32 %v957_v30, %v956_v27 }
 0x227   : > { %1295 = vpush %v914_v34  ;;  %v959_v38 = vrot.slane %v958_v35, 1 }
 0x228   : > { %1297 = vpush %v925_v36 }
 0x229   : > { %1299 = vpush %v936_v37  ;;  %v960_v40 = vadd.f32 %v959_v38, %v958_v35 }
 0x22a   : > { %1301 = vpush %v948_v39 }
 0x22b   : > { %1303 = vpush %v960_v40 }
 0x258   : > { %s1296_s23 = spop %1295 }
 0x259   : > { %s1298_s24 = spop %1297  ;;  %s916_s14 = smul.f32 0.5, %s1296_s23 }
 0x25a   : > { %s927_s25 = smul.f32 0.00048828125, %s1298_s24  ;;  %s1300_s26 = spop %1299 }
 0x25b   : > { %s938_s27 = smul.f32 0.00048828125, %s1300_s26  ;;  %s1302_s28 = spop %1301  ;;  %v972_v47 = vstv %s916_s14 }
 0x25c   : > { %s950_s29 = smul.f32 0.00048828125, %s1302_s28  ;;  %s1304_s30 = spop %1303 }
 0x25d   : > { %s939_s12 = sadd.f32 %s938_s27, %s927_s25  ;;  %s962_s13 = smul.f32 0.0006510417, %s1304_s30 }
 0x25f   : > { %s951_s15 = sadd.f32 %s950_s29, %s939_s12  ;;  %v970_v44 = vstv %s962_s13 }
 0x261   : > { %v969_v46 = vstv %s951_s15 }
 0x262   : > { %v971_v48 = vsel %vm968_vm3, %v969_v46, %v970_v44 }
 0x263   : > { %v973_v49 = vsel %vm967_vm4, %v972_v47, %v971_v48 }
 0x264   : > { %v974_v50 = vmul.f32 %v1332_v45, %v973_v49 }
 0x266   : > { %v976_v51 = vsel %vm975_vm5, %v974_v50, 0.0 }
 0x267   : > { %977 = vadd.xlane.f32.xlu1 %v976_v51 }
 0x26b   : > { %987 = vadd.xlane.f32.xlu1 %v986_v52 }
 0x2f4   : > { %v978_v54 = vpop.xlane.xlu1 %977 }
 0x2f5   : > { %v979_v55 = vrot.slane %v978_v54, 4 }
 0x2f7   : > { %v980_v56 = vadd.f32 %v979_v55, %v978_v54 }
 0x2f8   : > { %v988_v57 = vpop.xlane.xlu1 %987 }
 0x2f9   : > { %v981_v58 = vrot.slane %v980_v56, 2  ;;  %v989_v59 = vrot.slane %v988_v57, 4 }
 0x2fb   : > { %v990_v60 = vadd.f32 %v989_v59, %v988_v57  ;;  %v982_v61 = vadd.f32 %v981_v58, %v980_v56 }
 0x2fd   : > { %v991_v53 = vrot.slane %v990_v60, 2  ;;  %v983_v62 = vrot.slane %v982_v61, 1 }
 0x2ff   : > { %v992_v63 = vadd.f32 %v991_v53, %v990_v60  ;;  %v984_v0 = vadd.f32 %v983_v62, %v982_v61 }
 0x301   : > { %1305 = vpush %v984_v0  ;;  %v993_v1 = vrot.slane %v992_v63, 1 }
 0x303   : > { %v994_v2 = vadd.f32 %v993_v1, %v992_v63 }
 0x305   : > { %1307 = vpush %v994_v2 }
 0x332   : > { %s1306_s16 = spop %1305 }
 0x336   : > { %s1308_s19 = spop %1307 }
 0x337   : > { %s996_s20 = smul.f32 2.0, %s1308_s19 }
 0x339   : > { %s997_s21 = sadd.f32 %s1306_s16, %s996_s20 }
 0x33b   : > { %v998_v3 = vstv %s997_s21 }
 0x33c   : > { %1000 = vst.msk [vmem:[#allocation6] sm:$0x1] %vm999_vm6, %v998_v3 }
 0x33d PF: > { %p1313_p3 = scmp.eq.s32.totalorder %s1440_s18, 3  ;;  %s1373_s22 = smov [#allocation6]  }
 0x33e   : > { %s1008_s23 = sshll.u32 %s1373_s22, 4  ;;  %s1009_s23 = int_to_ptr.vmem [resolvable:$true] %s1008_s23 }
 0x33f   : > { %s1333_s24 = scalar_lea.vmem %s1009_s23, 16  ;;  %s1339_s25 = scalar_lea.vmem %s1009_s23, 32 }
 0x340   : > { %p1334_p4 = scmp.ne.s32.totalorder %s1009_s23, %s1333_s24  ;;  %p1340_p7 = scmp.lt.s32.totalorder %s1009_s23, %s1009_s23 }
 0x341   : > { %p1341_p8 = scmp.lt.s32.totalorder %s1339_s25, %s1333_s24 }
 0x342   : > { %p1335_p5 = pnand %p1334_p4, %p1313_p3 }
 0x343   : > { %p1342_p9 = por %p1341_p8, %p1340_p7 }
 0x344   : > { %p1336_p6 = pneg %p1335_p5 }
 0x346   : > { %p1343_p10 = pnand %p1342_p9, %p1336_p6 }
 0x348   : > { %1346 = shalt.err (!%p1343_p10)
}
 0x349   : > { %s1347_s28 = scalar_lea.hbm %s1556_s11, 16 }
 0x34a   : > { %p1348_p11 = scmp.ne.s32.totalorder %s1556_s11, %s1347_s28  ;;  %p1353_p0 = scmp.lt.u32.totalorder %s1347_s28, %s1556_s11 }
 0x34c   : > { %p1349_p12 = pnand %p1348_p11, %p1313_p3 }
 0x34e   : > { %p1350_p13 = pneg %p1349_p12 }
 0x350   : > { %p1355_p1 = pnand %p1353_p0, %p1350_p13 }
 0x352   : > { %1358 = shalt.err (!%p1355_p1)
}
 0x353   : > { %1310 = dma.vmem_to_hbm [thread:$0]  (%p1313_p3), %s1009_s23, 16, %s1556_s11, [#allocation7]  }
 0x354   : > { %1364 = dma.done.wait (%p1313_p3), [#allocation7], 16  }
 0x355   : > { %1366 = vsyncadd (%p1313_p3), [#allocation7], 4294967280 }
 0x356 PF: > { %s22_s17 = sadd.s32 1, %s1369_s17  }
 0x357   : > { %p19_p2 = scmp.ge.s32.totalorder %s22_s17, 6  }
 0x359   :  { %21 = sbr.rel (!%p19_p2) target bundleno = 1 (0x1), region = 136 }
 0x360   :  { %1021 = vsyncpa [#allocation7], 1 }
 0x361   :  { %1023 = vsyncpa [#allocation7 + $0x1], 1 }

</bundles_post_ra>
